<compile_context>
chip_gen: v6e
topology: v6e:2x2x1
jax: 0.10.0
libtpu: 0.0.40
codegen_flags: <defaults>
</compile_context>

<pallas_src>
import math
import jax
import jax.numpy as jnp
from jax.experimental import pallas as pl
from jax.experimental.pallas import tpu as pltpu


# ----------------------------- kernel helpers -----------------------------

def _layer_norm(x, g, b, eps=1e-5):
    mu = jnp.mean(x, axis=-1, keepdims=True)
    var = jnp.mean(jnp.square(x - mu), axis=-1, keepdims=True)
    return (x - mu) * jax.lax.rsqrt(var + eps) * g + b


def _gelu(x):
    # exact (erf) GELU, matching torch.nn.GELU() default
    return 0.5 * x * (1.0 + jax.lax.erf(x * jnp.float32(1.0 / math.sqrt(2.0))))


# ----------------------- fused transformer stack kernel ---------------------

def transformer_stack_kernel(x_ref, wqkv_ref, wo_ref, w1_ref, w2_ref,
                             vec_ref, b1_ref, o_ref, x_sc):
    l = pl.program_id(0)
    B, T, D = x_sc.shape

    # Load the activation slab into resident VMEM scratch once.
    @pl.when(l == 0)
    def _():
        x_sc[...] = x_ref[...].astype(jnp.float32)

    x = x_sc[...]                                     # (B, T, D) f32

    # packed per-layer vector bank: [bq, bk, bv, bo, b2, ln1_g, ln1_b, ln2_g, ln2_b]
    vec = vec_ref[0]                                  # (9, D) f32
    bq, bk, bv, bo = vec[0], vec[1], vec[2], vec[3]
    b2 = vec[4]
    ln1_g, ln1_b, ln2_g, ln2_b = vec[5], vec[6], vec[7], vec[8]
    b1 = b1_ref[0, 0]                                 # (F,)

    # ---- self-attention (causal, single head), fused QKV projection ----
    xb = x.reshape(B * T, D).astype(jnp.bfloat16)
    qkv = jnp.dot(xb, wqkv_ref[0],
                  preferred_element_type=jnp.float32).reshape(B, T, 3 * D)
    q = qkv[:, :, 0 * D:1 * D] + bq
    k = qkv[:, :, 1 * D:2 * D] + bk
    v = qkv[:, :, 2 * D:3 * D] + bv

    scale = jnp.float32(1.0 / math.sqrt(D))
    scores = jnp.einsum('bqd,bkd->bqk',
                        q.astype(jnp.bfloat16), k.astype(jnp.bfloat16),
                        preferred_element_type=jnp.float32) * scale

    row = jax.lax.broadcasted_iota(jnp.int32, (T, T), 0)
    col = jax.lax.broadcasted_iota(jnp.int32, (T, T), 1)
    scores = jnp.where((col <= row)[None, :, :], scores, jnp.float32(-1e30))

    scores = scores - jnp.max(scores, axis=-1, keepdims=True)
    p = jnp.exp(scores)
    p = p * pl.reciprocal(jnp.sum(p, axis=-1, keepdims=True), approx=True)

    attn = jnp.einsum('bqk,bkd->bqd',
                      p.astype(jnp.bfloat16), v.astype(jnp.bfloat16),
                      preferred_element_type=jnp.float32)
    attn = jnp.dot(attn.reshape(B * T, D).astype(jnp.bfloat16), wo_ref[0],
                   preferred_element_type=jnp.float32).reshape(B, T, D) + bo

    # ---- residual + norm1 ----
    h = _layer_norm(x + attn, ln1_g, ln1_b)

    # ---- feed-forward: Linear -> GELU -> Linear ----
    ff = jnp.dot(h.reshape(B * T, D).astype(jnp.bfloat16), w1_ref[0],
                 preferred_element_type=jnp.float32) + b1
    ff = _gelu(ff)
    ff = jnp.dot(ff.astype(jnp.bfloat16), w2_ref[0],
                 preferred_element_type=jnp.float32).reshape(B, T, D) + b2

    # ---- residual + norm2 ----
    out = _layer_norm(h + ff, ln2_g, ln2_b)
    x_sc[...] = out

    @pl.when(l == pl.num_programs(0) - 1)
    def _():
        o_ref[...] = out.astype(o_ref.dtype)


def run_transformer_stack(x, sp):
    B, T, D = x.shape
    L, _, F = sp['w1'].shape
    return pl.pallas_call(
        transformer_stack_kernel,
        out_shape=jax.ShapeDtypeStruct((B, T, D), jnp.float32),
        grid_spec=pltpu.PrefetchScalarGridSpec(
            num_scalar_prefetch=0,
            grid=(L,),
            in_specs=[
                pl.BlockSpec((B, T, D), lambda l: (0, 0, 0)),       # x (fetched once)
                pl.BlockSpec((1, D, 3 * D), lambda l: (l, 0, 0)),   # wqkv stream
                pl.BlockSpec((1, D, D), lambda l: (l, 0, 0)),       # wo stream
                pl.BlockSpec((1, D, F), lambda l: (l, 0, 0)),       # w1 stream
                pl.BlockSpec((1, F, D), lambda l: (l, 0, 0)),       # w2 stream
                pl.BlockSpec((1, 9, D), lambda l: (l, 0, 0)),       # packed bias/LN bank
                pl.BlockSpec((1, 1, F), lambda l: (l, 0, 0)),       # b1
            ],
            out_specs=pl.BlockSpec((B, T, D), lambda l: (0, 0, 0)),
            scratch_shapes=[pltpu.VMEM((B, T, D), jnp.float32)]),
        compiler_params=pltpu.CompilerParams(
            dimension_semantics=("arbitrary",),
            vmem_limit_bytes=48 * 1024 * 1024),
    )(x, sp['wqkv'], sp['wo'], sp['w1'], sp['w2'], sp['vec9'], sp['b1'])


# --------------------------- vocab-tiled LM head ----------------------------

def lm_head_kernel(x_ref, lng_ref, lnb_ref, wet_ref, bh_ref, o_ref, h_sc):
    # Final LayerNorm computed once per batch row (vocab-tile axis j == 0),
    # reused for every 128-wide vocab tile.
    @pl.when(pl.program_id(1) == 0)
    def _():
        h = _layer_norm(x_ref[0].astype(jnp.float32), lng_ref[0], lnb_ref[0])
        h_sc[...] = h.astype(jnp.bfloat16)

    o_ref[0] = (jnp.dot(h_sc[...], wet_ref[...],
                        preferred_element_type=jnp.float32) + bh_ref[0])


def run_lm_head(x, params, tv=128):
    B, T, D = x.shape
    we_t = params['emb_t']                           # (D, V) bf16, pre-transposed at init
    V = we_t.shape[1]
    if V % tv != 0:
        tv = V                                        # fallback for odd vocab sizes
    nv = V // tv
    return pl.pallas_call(
        lm_head_kernel,
        out_shape=jax.ShapeDtypeStruct((B, T, V), jnp.float32),
        grid_spec=pltpu.PrefetchScalarGridSpec(
            num_scalar_prefetch=0,
            grid=(B, nv),
            in_specs=[
                pl.BlockSpec((1, T, D), lambda b, j: (b, 0, 0)),
                pl.BlockSpec((1, D), lambda b, j: (0, 0)),
                pl.BlockSpec((1, D), lambda b, j: (0, 0)),
                pl.BlockSpec((D, tv), lambda b, j: (0, j)),
                pl.BlockSpec((1, tv), lambda b, j: (0, j)),
            ],
            out_specs=pl.BlockSpec((1, T, tv), lambda b, j: (b, 0, j)),
            scratch_shapes=[pltpu.VMEM((T, D), jnp.bfloat16)]),
        compiler_params=pltpu.CompilerParams(
            dimension_semantics=("parallel", "arbitrary"),
            vmem_limit_bytes=48 * 1024 * 1024),
    )(x, params['lnf_g'], params['lnf_b'], we_t, params['head_b'])


# ------------------------------ model glue ---------------------------------

def init_params(key, vocab_size, d_model, num_layers, ff_hidden, max_seq_len):
    keys = jax.random.split(key, 2 + num_layers)

    def lin(kk, din, dout):
        return (jax.random.normal(kk, (din, dout), jnp.float32)
                * jnp.float32(1.0 / math.sqrt(din)))

    emb = jax.random.normal(keys[0], (vocab_size, d_model), jnp.float32) * 0.02

    wqkv, wo, w1, w2, vec9, b1 = [], [], [], [], [], []
    for l in range(num_layers):
        k = jax.random.split(keys[2 + l], 6)
        wq = lin(k[0], d_model, d_model)
        wk = lin(k[1], d_model, d_model)
        wv = lin(k[2], d_model, d_model)
        wqkv.append(jnp.concatenate([wq, wk, wv], axis=1))   # (D, 3D)
        wo.append(lin(k[3], d_model, d_model))
        w1.append(lin(k[4], d_model, ff_hidden))
        w2.append(lin(k[5], ff_hidden, d_model))
        zeros = jnp.zeros((d_model,), jnp.float32)
        ones = jnp.ones((d_model,), jnp.float32)
        # packed bank: [bq, bk, bv, bo, b2, ln1_g, ln1_b, ln2_g, ln2_b]
        vec9.append(jnp.stack([zeros, zeros, zeros, zeros, zeros,
                               ones, zeros, ones, zeros], axis=0))
        b1.append(jnp.zeros((1, ff_hidden), jnp.float32))

    return {
        'emb': emb,                                           # (V, D) f32 for lookup
        'emb_t': emb.T.astype(jnp.bfloat16),                  # (D, V) bf16, transposed ONCE
        'pos': jax.random.normal(keys[1], (1, max_seq_len, d_model),
                                 jnp.float32) * 0.02,
        'head_b': jnp.zeros((1, vocab_size), jnp.float32),
        'lnf_g': jnp.ones((1, d_model), jnp.float32),
        'lnf_b': jnp.zeros((1, d_model), jnp.float32),
        'stack': {
            'wqkv': jnp.stack(wqkv).astype(jnp.bfloat16),     # (L, D, 3D)
            'wo':   jnp.stack(wo).astype(jnp.bfloat16),       # (L, D, D)
            'w1':   jnp.stack(w1).astype(jnp.bfloat16),       # (L, D, F)
            'w2':   jnp.stack(w2).astype(jnp.bfloat16),       # (L, F, D)
            'vec9': jnp.stack(vec9).astype(jnp.float32),      # (L, 9, D)
            'b1':   jnp.stack(b1).astype(jnp.float32),        # (L, 1, F)
        },
    }


def language_model_forward(params, input_ids):
    B, T = input_ids.shape
    # token embedding lookup + positional embedding (glue); emb_dropout = id.
    x = jnp.take(params['emb'], input_ids, axis=0)            # (B, T, D) f32
    x = x + params['pos'][:, :T, :]
    x = run_transformer_stack(x, params['stack'])             # fused L-layer stack
    return run_lm_head(x, params)                             # (B, T, V)


# --------------------------------- main -------------------------------------

if __name__ == "__main__":
    # 128-aligned model dims (lane-dense vregs / full MXU tiles), small overall.
    vocab_size, d_model, num_layers, ff_hidden, max_seq_len = 256, 128, 2, 256, 16
    B, T = 2, 8

    key = jax.random.PRNGKey(0)
    pkey, dkey = jax.random.split(key)
    params = init_params(pkey, vocab_size, d_model, num_layers,
                         ff_hidden, max_seq_len)
    input_ids = jax.random.randint(dkey, (B, T), 0, vocab_size, dtype=jnp.int32)

    logits = language_model_forward(params, input_ids)
    logits = jax.block_until_ready(logits)

    assert logits.shape == (B, T, vocab_size), logits.shape
    assert bool(jnp.all(jnp.isfinite(logits)))
    print("KERNEL_OK")
</pallas_src>

<mosaic_0001>
module attributes {stable_mosaic.version = 11 : i64} {
  func.func @transformer_stack_kernel(%arg0: i32, %arg1: memref<2x8x128xf32, #tpu.memory_space<vmem>>, %arg2: memref<1x128x384xbf16, #tpu.memory_space<vmem>>, %arg3: memref<1x128x128xbf16, #tpu.memory_space<vmem>>, %arg4: memref<1x128x256xbf16, #tpu.memory_space<vmem>>, %arg5: memref<1x256x128xbf16, #tpu.memory_space<vmem>>, %arg6: memref<1x9x128xf32, #tpu.memory_space<vmem>>, %arg7: memref<1x1x256xf32, #tpu.memory_space<vmem>>, %arg8: memref<2x8x128xf32, #tpu.memory_space<vmem>>, %arg9: memref<2x8x128xf32, #tpu.memory_space<vmem>>) attributes {dimension_semantics = [#tpu.dimension_semantics<arbitrary>], iteration_bounds = array<i64: 2>, scalar_prefetch = 0 : i64, scratch_operands = 1 : i64, tpu.core_type = #tpu.core_type<tc>, window_params = [{pipeline_mode = #tpu.pipeline_mode<synchronous>, transform_indices = @transform_0, window_bounds = array<i64: 2, 8, 128>}, {transform_indices = @transform_1, window_bounds = array<i64: 1, 128, 384>}, {transform_indices = @transform_2, window_bounds = array<i64: 1, 128, 128>}, {transform_indices = @transform_3, window_bounds = array<i64: 1, 128, 256>}, {transform_indices = @transform_4, window_bounds = array<i64: 1, 256, 128>}, {transform_indices = @transform_5, window_bounds = array<i64: 1, 9, 128>}, {transform_indices = @transform_6, window_bounds = array<i64: 1, 1, 256>}, {pipeline_mode = #tpu.pipeline_mode<synchronous>, transform_indices = @transform_7, window_bounds = array<i64: 2, 8, 128>}]} {
    %c0_i32 = arith.constant 0 : i32
    %0 = arith.cmpi eq, %arg0, %c0_i32 : i32
    %1 = arith.extui %0 : i1 to i32
    %c0_i32_0 = arith.constant 0 : i32
    %2 = arith.cmpi ne, %1, %c0_i32_0 : i32
    scf.if %2 {
      %c0_47 = arith.constant 0 : index
      %c0_48 = arith.constant 0 : index
      %c0_49 = arith.constant 0 : index
      %157 = vector.load %arg1[%c0_47, %c0_48, %c0_49] : memref<2x8x128xf32, #tpu.memory_space<vmem>>, vector<2x8x128xf32>
      %c0_50 = arith.constant 0 : index
      %c0_51 = arith.constant 0 : index
      %c0_52 = arith.constant 0 : index
      %158 = vector.load %arg9[%c0_50, %c0_51, %c0_52] : memref<2x8x128xf32, #tpu.memory_space<vmem>>, vector<2x8x128xf32>
      tpu.vector_store %arg9[%c0_50, %c0_51, %c0_52], %157 {strides = array<i32>} : memref<2x8x128xf32, #tpu.memory_space<vmem>>, vector<2x8x128xf32>,
    } else {
    }
    %c0 = arith.constant 0 : index
    %c0_1 = arith.constant 0 : index
    %c0_2 = arith.constant 0 : index
    %3 = vector.load %arg9[%c0, %c0_1, %c0_2] : memref<2x8x128xf32, #tpu.memory_space<vmem>>, vector<2x8x128xf32>
    %c0_3 = arith.constant 0 : index
    %c0_4 = arith.constant 0 : index
    %c0_5 = arith.constant 0 : index
    %4 = vector.load %arg6[%c0_3, %c0_4, %c0_5] : memref<1x9x128xf32, #tpu.memory_space<vmem>>, vector<1x9x128xf32>
    %5 = vector.shape_cast %4 : vector<1x9x128xf32> to vector<9x128xf32>
    %6 = vector.extract_strided_slice %5 {offsets = [0, 0], sizes = [1, 128], strides = [1, 1]} : vector<9x128xf32> to vector<1x128xf32>
    %7 = vector.shape_cast %6 : vector<1x128xf32> to vector<128xf32>
    %8 = vector.extract_strided_slice %5 {offsets = [1, 0], sizes = [1, 128], strides = [1, 1]} : vector<9x128xf32> to vector<1x128xf32>
    %9 = vector.shape_cast %8 : vector<1x128xf32> to vector<128xf32>
    %10 = vector.extract_strided_slice %5 {offsets = [2, 0], sizes = [1, 128], strides = [1, 1]} : vector<9x128xf32> to vector<1x128xf32>
    %11 = vector.shape_cast %10 : vector<1x128xf32> to vector<128xf32>
    %12 = vector.extract_strided_slice %5 {offsets = [3, 0], sizes = [1, 128], strides = [1, 1]} : vector<9x128xf32> to vector<1x128xf32>
    %13 = vector.shape_cast %12 : vector<1x128xf32> to vector<128xf32>
    %14 = vector.extract_strided_slice %5 {offsets = [4, 0], sizes = [1, 128], strides = [1, 1]} : vector<9x128xf32> to vector<1x128xf32>
    %15 = vector.shape_cast %14 : vector<1x128xf32> to vector<128xf32>
    %16 = vector.extract_strided_slice %5 {offsets = [5, 0], sizes = [1, 128], strides = [1, 1]} : vector<9x128xf32> to vector<1x128xf32>
    %17 = vector.shape_cast %16 : vector<1x128xf32> to vector<128xf32>
    %18 = vector.extract_strided_slice %5 {offsets = [6, 0], sizes = [1, 128], strides = [1, 1]} : vector<9x128xf32> to vector<1x128xf32>
    %19 = vector.shape_cast %18 : vector<1x128xf32> to vector<128xf32>
    %20 = vector.extract_strided_slice %5 {offsets = [7, 0], sizes = [1, 128], strides = [1, 1]} : vector<9x128xf32> to vector<1x128xf32>
    %21 = vector.shape_cast %20 : vector<1x128xf32> to vector<128xf32>
    %22 = vector.extract_strided_slice %5 {offsets = [8, 0], sizes = [1, 128], strides = [1, 1]} : vector<9x128xf32> to vector<1x128xf32>
    %23 = vector.shape_cast %22 : vector<1x128xf32> to vector<128xf32>
    %c0_6 = arith.constant 0 : index
    %c0_7 = arith.constant 0 : index
    %c0_8 = arith.constant 0 : index
    %24 = vector.load %arg7[%c0_6, %c0_7, %c0_8] : memref<1x1x256xf32, #tpu.memory_space<vmem>>, vector<1x1x256xf32>
    %25 = vector.shape_cast %24 : vector<1x1x256xf32> to vector<256xf32>
    %26 = vector.shape_cast %3 : vector<2x8x128xf32> to vector<16x128xf32>
    %27 = arith.truncf %26 : vector<16x128xf32> to vector<16x128xbf16>
    %c0_9 = arith.constant 0 : index
    %c0_10 = arith.constant 0 : index
    %c0_11 = arith.constant 0 : index
    %28 = vector.load %arg2[%c0_9, %c0_10, %c0_11] : memref<1x128x384xbf16, #tpu.memory_space<vmem>>, vector<1x128x384xbf16>
    %29 = vector.shape_cast %28 : vector<1x128x384xbf16> to vector<128x384xbf16>
    %cst = arith.constant dense<0.000000e+00> : vector<16x384xf32>
    %30 = tpu.matmul %27, %29, %cst {dimension_numbers = #tpu.dot_dimension_numbers<[1], [0], [0], [1], [0, 0, 1, 1], [], []>} : vector<16x128xbf16>, vector<128x384xbf16>, vector<16x384xf32> -> vector<16x384xf32>
    %31 = vector.shape_cast %30 : vector<16x384xf32> to vector<2x8x384xf32>
    %32 = vector.extract_strided_slice %31 {offsets = [0, 0, 0], sizes = [2, 8, 128], strides = [1, 1, 1]} : vector<2x8x384xf32> to vector<2x8x128xf32>
    %33 = vector.shape_cast %7 : vector<128xf32> to vector<1x1x128xf32>
    %34 = vector.broadcast %33 : vector<1x1x128xf32> to vector<2x8x128xf32>
    %35 = arith.addf %32, %34 : vector<2x8x128xf32>
    %36 = vector.extract_strided_slice %31 {offsets = [0, 0, 128], sizes = [2, 8, 128], strides = [1, 1, 1]} : vector<2x8x384xf32> to vector<2x8x128xf32>
    %37 = vector.shape_cast %9 : vector<128xf32> to vector<1x1x128xf32>
    %38 = vector.broadcast %37 : vector<1x1x128xf32> to vector<2x8x128xf32>
    %39 = arith.addf %36, %38 : vector<2x8x128xf32>
    %40 = vector.extract_strided_slice %31 {offsets = [0, 0, 256], sizes = [2, 8, 128], strides = [1, 1, 1]} : vector<2x8x384xf32> to vector<2x8x128xf32>
    %41 = vector.shape_cast %11 : vector<128xf32> to vector<1x1x128xf32>
    %42 = vector.broadcast %41 : vector<1x1x128xf32> to vector<2x8x128xf32>
    %43 = arith.addf %40, %42 : vector<2x8x128xf32>
    %44 = arith.truncf %35 : vector<2x8x128xf32> to vector<2x8x128xbf16>
    %45 = arith.truncf %39 : vector<2x8x128xf32> to vector<2x8x128xbf16>
    "tpu.trace_start"() <{level = 10 : i32, message = "bqd,bkd->bqk"}> : () -> ()
    %cst_12 = arith.constant dense<0.000000e+00> : vector<2x8x8xf32>
    %46 = tpu.matmul %44, %45, %cst_12 {dimension_numbers = #tpu.dot_dimension_numbers<[2], [2], [1], [1], [0, 0, 0, 1, 1, 1], [0], [0]>} : vector<2x8x128xbf16>, vector<2x8x128xbf16>, vector<2x8x8xf32> -> vector<2x8x8xf32>
    "tpu.trace_stop"() : () -> ()
    %cst_13 = arith.constant 0.0883883461 : f32
    %47 = vector.broadcast %cst_13 : f32 to vector<2x8x8xf32>
    %48 = arith.mulf %46, %47 : vector<2x8x8xf32>
    %49 = tpu.iota {dimensions = array<i32: 0>} : vector<8x8xi32>
    %50 = tpu.iota {dimensions = array<i32: 1>} : vector<8x8xi32>
    %51 = arith.cmpi sle, %50, %49 : vector<8x8xi32>
    %52 = vector.shape_cast %51 : vector<8x8xi1> to vector<1x8x8xi1>
    %cst_14 = arith.constant -1.000000e+30 : f32
    %53 = vector.shape_cast %52 : vector<1x8x8xi1> to vector<1x8x8xi1>
    %54 = vector.broadcast %53 : vector<1x8x8xi1> to vector<2x8x8xi1>
    %55 = vector.broadcast %cst_14 : f32 to vector<2x8x8xf32>
    %56 = arith.select %54, %48, %55 : vector<2x8x8xi1>, vector<2x8x8xf32>
    %cst_15 = arith.constant dense<0xFF800000> : vector<2x8xf32>
    %57 = vector.multi_reduction <maximumf>, %56, %cst_15 [2] : vector<2x8x8xf32> to vector<2x8xf32>
    %58 = vector.shape_cast %57 : vector<2x8xf32> to vector<2x8x1xf32>
    %59 = vector.broadcast %58 : vector<2x8x1xf32> to vector<2x8x8xf32>
    %60 = arith.subf %56, %59 : vector<2x8x8xf32>
    %61 = math.exp %60 : vector<2x8x8xf32>
    %cst_16 = arith.constant dense<0.000000e+00> : vector<2x8xf32>
    %62 = vector.multi_reduction <add>, %61, %cst_16 [2] : vector<2x8x8xf32> to vector<2x8xf32>
    %63 = vector.shape_cast %62 : vector<2x8xf32> to vector<2x8x1xf32>
    %64 = tpu.reciprocal %63 {approx = true} : vector<2x8x1xf32> -> vector<2x8x1xf32>
    %65 = vector.broadcast %64 : vector<2x8x1xf32> to vector<2x8x8xf32>
    %66 = arith.mulf %61, %65 : vector<2x8x8xf32>
    %67 = arith.truncf %66 : vector<2x8x8xf32> to vector<2x8x8xbf16>
    %68 = arith.truncf %43 : vector<2x8x128xf32> to vector<2x8x128xbf16>
    "tpu.trace_start"() <{level = 10 : i32, message = "bqk,bkd->bqd"}> : () -> ()
    %cst_17 = arith.constant dense<0.000000e+00> : vector<2x8x128xf32>
    %69 = tpu.matmul %67, %68, %cst_17 {dimension_numbers = #tpu.dot_dimension_numbers<[2], [1], [1], [2], [0, 0, 0, 1, 1, 2], [0], [0]>} : vector<2x8x8xbf16>, vector<2x8x128xbf16>, vector<2x8x128xf32> -> vector<2x8x128xf32>
    "tpu.trace_stop"() : () -> ()
    %70 = vector.shape_cast %69 : vector<2x8x128xf32> to vector<16x128xf32>
    %71 = arith.truncf %70 : vector<16x128xf32> to vector<16x128xbf16>
    %c0_18 = arith.constant 0 : index
    %c0_19 = arith.constant 0 : index
    %c0_20 = arith.constant 0 : index
    %72 = vector.load %arg3[%c0_18, %c0_19, %c0_20] : memref<1x128x128xbf16, #tpu.memory_space<vmem>>, vector<1x128x128xbf16>
    %73 = vector.shape_cast %72 : vector<1x128x128xbf16> to vector<128x128xbf16>
    %cst_21 = arith.constant dense<0.000000e+00> : vector<16x128xf32>
    %74 = tpu.matmul %71, %73, %cst_21 {dimension_numbers = #tpu.dot_dimension_numbers<[1], [0], [0], [1], [0, 0, 1, 1], [], []>} : vector<16x128xbf16>, vector<128x128xbf16>, vector<16x128xf32> -> vector<16x128xf32>
    %75 = vector.shape_cast %74 : vector<16x128xf32> to vector<2x8x128xf32>
    %76 = vector.shape_cast %13 : vector<128xf32> to vector<1x1x128xf32>
    %77 = vector.broadcast %76 : vector<1x1x128xf32> to vector<2x8x128xf32>
    %78 = arith.addf %75, %77 : vector<2x8x128xf32>
    %79 = arith.addf %3, %78 : vector<2x8x128xf32>
    %cst_22 = arith.constant dense<0.000000e+00> : vector<2x8xf32>
    %80 = vector.multi_reduction <add>, %79, %cst_22 [2] : vector<2x8x128xf32> to vector<2x8xf32>
    %81 = vector.shape_cast %80 : vector<2x8xf32> to vector<2x8x1xf32>
    %cst_23 = arith.constant 1.280000e+02 : f32
    %82 = vector.broadcast %cst_23 : f32 to vector<2x8x1xf32>
    %83 = arith.divf %81, %82 : vector<2x8x1xf32>
    %84 = vector.broadcast %83 : vector<2x8x1xf32> to vector<2x8x128xf32>
    %85 = arith.subf %79, %84 : vector<2x8x128xf32>
    %86 = arith.mulf %85, %85 : vector<2x8x128xf32>
    %cst_24 = arith.constant dense<0.000000e+00> : vector<2x8xf32>
    %87 = vector.multi_reduction <add>, %86, %cst_24 [2] : vector<2x8x128xf32> to vector<2x8xf32>
    %88 = vector.shape_cast %87 : vector<2x8xf32> to vector<2x8x1xf32>
    %cst_25 = arith.constant 1.280000e+02 : f32
    %89 = vector.broadcast %cst_25 : f32 to vector<2x8x1xf32>
    %90 = arith.divf %88, %89 : vector<2x8x1xf32>
    %91 = vector.broadcast %83 : vector<2x8x1xf32> to vector<2x8x128xf32>
    %92 = arith.subf %79, %91 : vector<2x8x128xf32>
    %cst_26 = arith.constant 9.99999974E-6 : f32
    %93 = vector.broadcast %cst_26 : f32 to vector<2x8x1xf32>
    %94 = arith.addf %90, %93 : vector<2x8x1xf32>
    %95 = math.rsqrt %94 : vector<2x8x1xf32>
    %96 = vector.broadcast %95 : vector<2x8x1xf32> to vector<2x8x128xf32>
    %97 = arith.mulf %92, %96 : vector<2x8x128xf32>
    %98 = vector.shape_cast %17 : vector<128xf32> to vector<1x1x128xf32>
    %99 = vector.broadcast %98 : vector<1x1x128xf32> to vector<2x8x128xf32>
    %100 = arith.mulf %97, %99 : vector<2x8x128xf32>
    %101 = vector.shape_cast %19 : vector<128xf32> to vector<1x1x128xf32>
    %102 = vector.broadcast %101 : vector<1x1x128xf32> to vector<2x8x128xf32>
    %103 = arith.addf %100, %102 : vector<2x8x128xf32>
    %104 = vector.shape_cast %103 : vector<2x8x128xf32> to vector<16x128xf32>
    %105 = arith.truncf %104 : vector<16x128xf32> to vector<16x128xbf16>
    %c0_27 = arith.constant 0 : index
    %c0_28 = arith.constant 0 : index
    %c0_29 = arith.constant 0 : index
    %106 = vector.load %arg4[%c0_27, %c0_28, %c0_29] : memref<1x128x256xbf16, #tpu.memory_space<vmem>>, vector<1x128x256xbf16>
    %107 = vector.shape_cast %106 : vector<1x128x256xbf16> to vector<128x256xbf16>
    %cst_30 = arith.constant dense<0.000000e+00> : vector<16x256xf32>
    %108 = tpu.matmul %105, %107, %cst_30 {dimension_numbers = #tpu.dot_dimension_numbers<[1], [0], [0], [1], [0, 0, 1, 1], [], []>} : vector<16x128xbf16>, vector<128x256xbf16>, vector<16x256xf32> -> vector<16x256xf32>
    %109 = vector.shape_cast %25 : vector<256xf32> to vector<1x256xf32>
    %110 = vector.broadcast %109 : vector<1x256xf32> to vector<16x256xf32>
    %111 = arith.addf %108, %110 : vector<16x256xf32>
    %cst_31 = arith.constant 5.000000e-01 : f32
    %112 = vector.broadcast %cst_31 : f32 to vector<16x256xf32>
    %113 = arith.mulf %112, %111 : vector<16x256xf32>
    %cst_32 = arith.constant 0.707106769 : f32
    %114 = vector.broadcast %cst_32 : f32 to vector<16x256xf32>
    %115 = arith.mulf %111, %114 : vector<16x256xf32>
    %116 = math.erf %115 : vector<16x256xf32>
    %cst_33 = arith.constant 1.000000e+00 : f32
    %117 = vector.broadcast %cst_33 : f32 to vector<16x256xf32>
    %118 = arith.addf %117, %116 : vector<16x256xf32>
    %119 = arith.mulf %113, %118 : vector<16x256xf32>
    %120 = arith.truncf %119 : vector<16x256xf32> to vector<16x256xbf16>
    %c0_34 = arith.constant 0 : index
    %c0_35 = arith.constant 0 : index
    %c0_36 = arith.constant 0 : index
    %121 = vector.load %arg5[%c0_34, %c0_35, %c0_36] : memref<1x256x128xbf16, #tpu.memory_space<vmem>>, vector<1x256x128xbf16>
    %122 = vector.shape_cast %121 : vector<1x256x128xbf16> to vector<256x128xbf16>
    %cst_37 = arith.constant dense<0.000000e+00> : vector<16x128xf32>
    %123 = tpu.matmul %120, %122, %cst_37 {dimension_numbers = #tpu.dot_dimension_numbers<[1], [0], [0], [1], [0, 0, 1, 1], [], []>} : vector<16x256xbf16>, vector<256x128xbf16>, vector<16x128xf32> -> vector<16x128xf32>
    %124 = vector.shape_cast %123 : vector<16x128xf32> to vector<2x8x128xf32>
    %125 = vector.shape_cast %15 : vector<128xf32> to vector<1x1x128xf32>
    %126 = vector.broadcast %125 : vector<1x1x128xf32> to vector<2x8x128xf32>
    %127 = arith.addf %124, %126 : vector<2x8x128xf32>
    %128 = arith.addf %103, %127 : vector<2x8x128xf32>
    %cst_38 = arith.constant dense<0.000000e+00> : vector<2x8xf32>
    %129 = vector.multi_reduction <add>, %128, %cst_38 [2] : vector<2x8x128xf32> to vector<2x8xf32>
    %130 = vector.shape_cast %129 : vector<2x8xf32> to vector<2x8x1xf32>
    %cst_39 = arith.constant 1.280000e+02 : f32
    %131 = vector.broadcast %cst_39 : f32 to vector<2x8x1xf32>
    %132 = arith.divf %130, %131 : vector<2x8x1xf32>
    %133 = vector.broadcast %132 : vector<2x8x1xf32> to vector<2x8x128xf32>
    %134 = arith.subf %128, %133 : vector<2x8x128xf32>
    %135 = arith.mulf %134, %134 : vector<2x8x128xf32>
    %cst_40 = arith.constant dense<0.000000e+00> : vector<2x8xf32>
    %136 = vector.multi_reduction <add>, %135, %cst_40 [2] : vector<2x8x128xf32> to vector<2x8xf32>
    %137 = vector.shape_cast %136 : vector<2x8xf32> to vector<2x8x1xf32>
    %cst_41 = arith.constant 1.280000e+02 : f32
    %138 = vector.broadcast %cst_41 : f32 to vector<2x8x1xf32>
    %139 = arith.divf %137, %138 : vector<2x8x1xf32>
    %140 = vector.broadcast %132 : vector<2x8x1xf32> to vector<2x8x128xf32>
    %141 = arith.subf %128, %140 : vector<2x8x128xf32>
    %cst_42 = arith.constant 9.99999974E-6 : f32
    %142 = vector.broadcast %cst_42 : f32 to vector<2x8x1xf32>
    %143 = arith.addf %139, %142 : vector<2x8x1xf32>
    %144 = math.rsqrt %143 : vector<2x8x1xf32>
    %145 = vector.broadcast %144 : vector<2x8x1xf32> to vector<2x8x128xf32>
    %146 = arith.mulf %141, %145 : vector<2x8x128xf32>
    %147 = vector.shape_cast %21 : vector<128xf32> to vector<1x1x128xf32>
    %148 = vector.broadcast %147 : vector<1x1x128xf32> to vector<2x8x128xf32>
    %149 = arith.mulf %146, %148 : vector<2x8x128xf32>
    %150 = vector.shape_cast %23 : vector<128xf32> to vector<1x1x128xf32>
    %151 = vector.broadcast %150 : vector<1x1x128xf32> to vector<2x8x128xf32>
    %152 = arith.addf %149, %151 : vector<2x8x128xf32>
    %c0_43 = arith.constant 0 : index
    %c0_44 = arith.constant 0 : index
    %c0_45 = arith.constant 0 : index
    %153 = vector.load %arg9[%c0_43, %c0_44, %c0_45] : memref<2x8x128xf32, #tpu.memory_space<vmem>>, vector<2x8x128xf32>
    tpu.vector_store %arg9[%c0_43, %c0_44, %c0_45], %152 {strides = array<i32>} : memref<2x8x128xf32, #tpu.memory_space<vmem>>, vector<2x8x128xf32>,
    %c1_i32 = arith.constant 1 : i32
    %154 = arith.cmpi eq, %arg0, %c1_i32 : i32
    %155 = arith.extui %154 : i1 to i32
    %c0_i32_46 = arith.constant 0 : i32
    %156 = arith.cmpi ne, %155, %c0_i32_46 : i32
    scf.if %156 {
      %c0_47 = arith.constant 0 : index
      %c0_48 = arith.constant 0 : index
      %c0_49 = arith.constant 0 : index
      %157 = vector.load %arg8[%c0_47, %c0_48, %c0_49] : memref<2x8x128xf32, #tpu.memory_space<vmem>>, vector<2x8x128xf32>
      tpu.vector_store %arg8[%c0_47, %c0_48, %c0_49], %152 {strides = array<i32>} : memref<2x8x128xf32, #tpu.memory_space<vmem>>, vector<2x8x128xf32>,
    } else {
    }
    return
  }
  func.func @transform_0(%arg0: i32) -> (i32, i32, i32) {
    %c0_i32 = arith.constant 0 : i32
    %c0_i32_0 = arith.constant 0 : i32
    %c0_i32_1 = arith.constant 0 : i32
    %c0_i32_2 = arith.constant 0 : i32
    return %c0_i32, %c0_i32_0, %c0_i32_1 : i32, i32, i32
  }
  func.func @transform_1(%arg0: i32) -> (i32, i32, i32) {
    %c0_i32 = arith.constant 0 : i32
    %c0_i32_0 = arith.constant 0 : i32
    %c0_i32_1 = arith.constant 0 : i32
    return %arg0, %c0_i32, %c0_i32_0 : i32, i32, i32
  }
  func.func @transform_2(%arg0: i32) -> (i32, i32, i32) {
    %c0_i32 = arith.constant 0 : i32
    %c0_i32_0 = arith.constant 0 : i32
    %c0_i32_1 = arith.constant 0 : i32
    return %arg0, %c0_i32, %c0_i32_0 : i32, i32, i32
  }
  func.func @transform_3(%arg0: i32) -> (i32, i32, i32) {
    %c0_i32 = arith.constant 0 : i32
    %c0_i32_0 = arith.constant 0 : i32
    %c0_i32_1 = arith.constant 0 : i32
    return %arg0, %c0_i32, %c0_i32_0 : i32, i32, i32
  }
  func.func @transform_4(%arg0: i32) -> (i32, i32, i32) {
    %c0_i32 = arith.constant 0 : i32
    %c0_i32_0 = arith.constant 0 : i32
    %c0_i32_1 = arith.constant 0 : i32
    return %arg0, %c0_i32, %c0_i32_0 : i32, i32, i32
  }
  func.func @transform_5(%arg0: i32) -> (i32, i32, i32) {
    %c0_i32 = arith.constant 0 : i32
    %c0_i32_0 = arith.constant 0 : i32
    %c0_i32_1 = arith.constant 0 : i32
    return %arg0, %c0_i32, %c0_i32_0 : i32, i32, i32
  }
  func.func @transform_6(%arg0: i32) -> (i32, i32, i32) {
    %c0_i32 = arith.constant 0 : i32
    %c0_i32_0 = arith.constant 0 : i32
    %c0_i32_1 = arith.constant 0 : i32
    return %arg0, %c0_i32, %c0_i32_0 : i32, i32, i32
  }
  func.func @transform_7(%arg0: i32) -> (i32, i32, i32) {
    %c0_i32 = arith.constant 0 : i32
    %c0_i32_0 = arith.constant 0 : i32
    %c0_i32_1 = arith.constant 0 : i32
    %c0_i32_2 = arith.constant 0 : i32
    return %c0_i32, %c0_i32_0, %c0_i32_1 : i32, i32, i32
  }
}

</mosaic_0001>

<bundles_post_ra>
// kernel: tpu_custom_call.1
= control target key start
LH: loop header
LB: loop body
LE: loop exit
PB: predicated region body
PF: predicated region fallthrough
CT: control target
= control target key end

     0   :  { %s2666_s0 = inlined_call_operand.vmem [shape: f32[2,8,128], index: 0, kind: input, shape index: {}]   ;;  %s2667_s1 = inlined_call_operand.hbm [shape: bf16[2,128,384], index: 1, kind: input, shape index: {}]   ;;  %s2668_s2 = inlined_call_operand.hbm [shape: bf16[2,128,128], index: 2, kind: input, shape index: {}]   ;;  %s2669_s3 = inlined_call_operand.hbm [shape: bf16[2,128,256], index: 3, kind: input, shape index: {}]   ;;  %s2670_s4 = inlined_call_operand.hbm [shape: bf16[2,256,128], index: 4, kind: input, shape index: {}]   ;;  %s2671_s5 = inlined_call_operand.vmem [shape: f32[2,9,128], index: 5, kind: input, shape index: {}]   ;;  %s2672_s6 = inlined_call_operand.vmem [shape: f32[2,1,256], index: 6, kind: input, shape index: {}]   ;;  %s2673_s7 = inlined_call_operand.hbm [shape: f32[2,8,128], index: 7, kind: output, shape index: {}]  }
   0x1   :  { %2677 = sst [smem:[#allocation16_spill]] %s2667_s1 }
   0x2   :  { %2678 = sst [smem:[#allocation17_spill]] %s2668_s2 }
   0x3   :  { %12 = vsyncpa [#allocation4], 0 }
   0x4   :  { %14 = vsyncpa [#allocation4 + $0x1], 0 }
   0x5   :  { %15 = vsyncpa [#allocation7], 0 }
   0x6   :  { %17 = vsyncpa [#allocation7 + $0x1], 0 }
   0x7   :  { %18 = vsyncpa [#allocation10], 0 }
   0x8   :  { %20 = vsyncpa [#allocation10 + $0x1], 0 }
   0x9   :  { %21 = vsyncpa [#allocation5], 0  ;;  %s2249_s24 = smov 0   ;;  %s2251_s25 = smov 0  }
   0xa   :  { %s2253_s26 = smov 0   ;;  %s2255_s27 = smov 0  }
   0xb LB: > { %s2268_s28 = sadd.s32 4294967295, %s2191_s27   ;;  %s2271_s29 = sadd.s32 1, %s2191_s27   ;;  %s2191_s27 = sphi %s2255_s27, %s2692_s27   ;;  %s2187_s26 = sphi %s2253_s26, %s2691_s26   ;;  %s2183_s25 = sphi %s2251_s25, %s2690_s25   ;;  %s2179_s24 = sphi %s2249_s24, %s2689_s24  }
   0xc   : > { %s52_s30 = ssub.s32 %s2191_s27, %s2271_s29  ;;  %s55_s8 = sadd.s32 1, %s2187_s26 }
   0xd   : > { %p53_p0 = scmp.eq.s32.totalorder %s52_s30, 0  ;;  %p62_p1 = scmp.ne.s32.totalorder %s2187_s26, %s2183_s25 }
   0xe   : > { %p63_p2 = scmp.eq.s32.totalorder %s2191_s27, 0  ;;  %p68_p3 = scmp.ne.s32.totalorder %s2183_s25, %s2179_s24 }
   0xf   : > { %s2281_s9 = scalar_select %p53_p0, %s2187_s26, %s55_s8  }
  0x10   : > { %p64_p4 = por %p63_p2, %p62_p1  ;;  %p69_p5 = scmp.eq.s32.totalorder %s2268_s28, 0 }
  0x11   : > { %p1858_p6 = scmp.lt.s32.totalorder %s2191_s27, 2  ;;  %s2290_s11 = sand.u32 1, %s2187_s26  }
  0x12   : > { %p2285_p7 = por %p69_p5, %p68_p3  ;;  %s267_s13 = sand.u32 1, %s2191_s27  }
  0x13   : > { %p2292_p8 = pnand %p1858_p6, %p64_p4  ;;  %s1625_s14 = sshll.u32 %s2290_s11, 6 }
  0x14   : > { %s2679_s10 = scalar_select %p2285_p7, 1, 0 }
  0x15   : > { %s1714_s15 = sshll.u32 %s2191_s27, 10  ;;  %s271_s16 = scalar_lea.vmem [#allocation6], %s1625_s14 }
  0x16   : > { %s278_s17 = sshll.u32 %s271_s16, 4  ;;  %s2681_s2 = sld [smem:[#allocation17_spill]]  ;;  %s2304_s17 = int_to_ptr.vmem [resolvable:$true] %s278_s17 }
  0x17   : > { %s2306_s21 = scalar_lea.sflag [#allocation7], %s267_s13  ;;  %p2312_p10 = pneg %p2292_p8 }
  0x1c   : > { %s2302_s20 = scalar_lea.hbm %s2681_s2, %s1714_s15  ;;  %s2014_s8 = scalar_lea.hbm %s2681_s2, 2048 }
  0x1d   : > { %s2009_s22 = scalar_lea.hbm %s2302_s20, 1024  ;;  %p2015_p13 = scmp.lt.s32.totalorder %s2302_s20, %s2681_s2 }
  0x1e   : > { %p2010_p9 = scmp.ne.s32.totalorder %s2302_s20, %s2009_s22  ;;  %p2016_p0 = scmp.lt.s32.totalorder %s2014_s8, %s2009_s22 }
  0x20   : > { %p2012_p11 = pnand %p2312_p10, %p2010_p9  ;;  %p2017_p1 = por %p2016_p0, %p2015_p13 }
  0x22   : > { %p2013_p12 = pneg %p2012_p11 }
  0x24   : > { %p2018_p2 = pnand %p2017_p1, %p2013_p12 }
  0x26   : > { %2021 = shalt.err (!%p2018_p2)
}
  0x27   : > { %s2022_s13 = scalar_lea.vmem %s2304_s17, 1024  ;;  %s2193_s16 = smov [#allocation6]  }
  0x28   : > { %p2023_p3 = scmp.ne.s32.totalorder %s2304_s17, %s2022_s13  ;;  %s2027_s18 = sshll.u32 %s2193_s16, 4  ;;  %s2028_s18 = int_to_ptr.vmem [resolvable:$false] %s2027_s18 }
  0x29   : > { %s2029_s19 = scalar_lea.vmem %s2028_s18, 2048  ;;  %p2030_p6 = scmp.lt.s32.totalorder %s2304_s17, %s2028_s18 }
  0x2a   : > { %p2025_p4 = pnand %p2023_p3, %p2312_p10  ;;  %p2031_p9 = scmp.lt.s32.totalorder %s2029_s19, %s2022_s13 }
  0x2c   : > { %p2026_p5 = pneg %p2025_p4  ;;  %p2032_p11 = por %p2031_p9, %p2030_p6 }
  0x2e   : > { %p2033_p7 = pnand %p2032_p11, %p2026_p5 }
  0x30   : > { %2036 = shalt.err (!%p2033_p7)
}
  0x31   : > { %s2675_s22 = smov 64   ;;  %s2676_s24 = smov 4  }
  0x32   : > { %1851 = dma.hbm_to_vmem [thread:$0]  (!%p2292_p8), %s2302_s20, 1024, %s2304_s17, %s2306_s21, %s2675_s22, %s2675_s22, %s2676_s24  }
  0x33   : > { %p1634_p12 = scmp.ge.s32.totalorder %s2191_s27, 1  ;;  %p343_p13 = scmp.lt.s32.totalorder %s2191_s27, 3 }
  0x34   : > { %s1830_s30 = smul.u32 192, %s2290_s11  ;;  %s2684_s1 = sld [smem:[#allocation16_spill]] }
  0x35   : > { %p2341_p7 = pnand %p1634_p12, %p343_p13  ;;  %s1831_s14 = smul.u32 3072, %s2191_s27 }
  0x36   : > { %s250_s18 = scalar_lea.vmem [#allocation3], %s1830_s30  ;;  %s247_s17 = scalar_lea.sflag [#allocation4], %s2290_s11 }
  0x37   : > { %s2683_s8 = scalar_select %p2341_p7, 1, 0 }
  0x38   : > { %s257_s19 = sshll.u32 %s250_s18, 4  ;;  %s2351_s19 = int_to_ptr.vmem [resolvable:$true] %s257_s19 }
  0x3a   : > { %s2349_s16 = scalar_lea.hbm %s2684_s1, %s1831_s14  ;;  %s2042_s2 = scalar_lea.hbm %s2684_s1, 6144 }
  0x3b   : > { %s2037_s20 = scalar_lea.hbm %s2349_s16, 3072  ;;  %p2043_p3 = scmp.lt.s32.totalorder %s2349_s16, %s2684_s1 }
  0x3c   : > { %p2038_p0 = scmp.ne.s32.totalorder %s2349_s16, %s2037_s20  ;;  %p2044_p4 = scmp.lt.s32.totalorder %s2042_s2, %s2037_s20 }
  0x3e   : > { %p2040_p1 = pnand %p2038_p0, %p2312_p10  ;;  %p2045_p5 = por %p2044_p4, %p2043_p3 }
  0x40   : > { %p2041_p2 = pneg %p2040_p1 }
  0x42   : > { %p2046_p6 = pnand %p2045_p5, %p2041_p2 }
  0x44   : > { %2049 = shalt.err (!%p2046_p6)
}
  0x45   : > { %s2050_s30 = scalar_lea.vmem %s2351_s19, 3072  ;;  %s2196_s13 = smov [#allocation3]  }
  0x46   : > { %p2051_p9 = scmp.ne.s32.totalorder %s2351_s19, %s2050_s30  ;;  %s2055_s22 = sshll.u32 %s2196_s13, 4  ;;  %s2056_s22 = int_to_ptr.vmem [resolvable:$false] %s2055_s22 }
  0x47   : > { %s2057_s24 = scalar_lea.vmem %s2056_s22, 6144  ;;  %p2058_p13 = scmp.lt.s32.totalorder %s2351_s19, %s2056_s22 }
  0x48   : > { %p2053_p11 = pnand %p2051_p9, %p2312_p10  ;;  %p2059_p0 = scmp.lt.s32.totalorder %s2057_s24, %s2050_s30 }
  0x4a   : > { %p2054_p12 = pneg %p2053_p11  ;;  %p2060_p1 = por %p2059_p0, %p2058_p13 }
  0x4c   : > { %p2061_p7 = pnand %p2060_p1, %p2054_p12 }
  0x4e   : > { %2064 = shalt.err (!%p2061_p7)
}
  0x4f   : > { %s2197_s2 = smov 192   ;;  %s2198_s18 = smov 12  }
  0x50   : > { %1848 = dma.hbm_to_vmem [thread:$0]  (!%p2292_p8), %s2349_s16, 3072, %s2351_s19, %s247_s17, %s2197_s2, %s2197_s2, %s2198_s18  }
  0x51   : > { %s1628_s20 = sshll.u32 %s2290_s11, 7  ;;  %s1715_s15 = sshll.u32 %s2191_s27, 11 }
  0x52   : > { %s2383_s13 = scalar_lea.hbm %s2669_s3, %s1715_s15  ;;  %s292_s22 = scalar_lea.vmem [#allocation8], %s1628_s20 }
  0x53   : > { %s299_s24 = sshll.u32 %s292_s22, 4  ;;  %s2065_s1 = scalar_lea.hbm %s2383_s13, 2048  ;;  %s2387_s24 = int_to_ptr.vmem [resolvable:$true] %s299_s24 }
  0x54   : > { %p2066_p7 = scmp.ne.s32.totalorder %s2383_s13, %s2065_s1  ;;  %s2070_s17 = scalar_lea.hbm %s2669_s3, 4096 }
  0x55   : > { %p2071_p4 = scmp.lt.s32.totalorder %s2383_s13, %s2669_s3  ;;  %p2072_p5 = scmp.lt.s32.totalorder %s2070_s17, %s2065_s1 }
  0x56   : > { %p2068_p2 = pnand %p2066_p7, %p2312_p10 }
  0x57   : > { %p2073_p6 = por %p2072_p5, %p2071_p4 }
  0x58   : > { %p2069_p3 = pneg %p2068_p2 }
  0x5a   : > { %p2074_p9 = pnand %p2073_p6, %p2069_p3 }
  0x5c   : > { %2077 = shalt.err (!%p2074_p9)
}
  0x5d   : > { %s2078_s14 = scalar_lea.vmem %s2387_s24, 2048  ;;  %s2199_s30 = smov [#allocation8]  }
  0x5e   : > { %p2079_p11 = scmp.ne.s32.totalorder %s2387_s24, %s2078_s14  ;;  %s2083_s22 = sshll.u32 %s2199_s30, 4  ;;  %s2084_s22 = int_to_ptr.vmem [resolvable:$false] %s2083_s22 }
  0x5f   : > { %s2085_s16 = scalar_lea.vmem %s2084_s22, 4096  ;;  %p2086_p0 = scmp.lt.s32.totalorder %s2387_s24, %s2084_s22 }
  0x60   : > { %p2081_p12 = pnand %p2079_p11, %p2312_p10  ;;  %p2087_p1 = scmp.lt.s32.totalorder %s2085_s16, %s2078_s14 }
  0x62   : > { %p2082_p13 = pneg %p2081_p12  ;;  %p2088_p7 = por %p2087_p1, %p2086_p0 }
  0x64   : > { %p2089_p2 = pnand %p2088_p7, %p2082_p13 }
  0x66   : > { %2092 = shalt.err (!%p2089_p2)
}
  0x67   : > { %s2200_s1 = smov 128   ;;  %s2201_s19 = smov 8  }
  0x68   : > { %1854 = dma.hbm_to_vmem [thread:$0]  (!%p2292_p8), %s2383_s13, 2048, %s2387_s24, %s2306_s21, %s2200_s1, %s2200_s1, %s2201_s19  }
  0x69   : > { %s2415_s18 = scalar_lea.hbm %s2670_s4, %s1715_s15  ;;  %s313_s14 = scalar_lea.vmem [#allocation9], %s1628_s20 }
  0x6a   : > { %s320_s30 = sshll.u32 %s313_s14, 4  ;;  %s310_s22 = scalar_lea.sflag [#allocation10], %s2290_s11  ;;  %s2419_s30 = int_to_ptr.vmem [resolvable:$true] %s320_s30 }
  0x6b   : > { %s2093_s16 = scalar_lea.hbm %s2415_s18, 2048  ;;  %s2098_s13 = scalar_lea.hbm %s2670_s4, 4096 }
  0x6c   : > { %p2094_p3 = scmp.ne.s32.totalorder %s2415_s18, %s2093_s16  ;;  %p2099_p6 = scmp.lt.s32.totalorder %s2415_s18, %s2670_s4 }
  0x6d   : > { %p2100_p9 = scmp.lt.s32.totalorder %s2098_s13, %s2093_s16 }
  0x6e   : > { %p2096_p4 = pnand %p2094_p3, %p2312_p10 }
  0x6f   : > { %p2101_p11 = por %p2100_p9, %p2099_p6 }
  0x70   : > { %p2097_p5 = pneg %p2096_p4 }
  0x72   : > { %p2102_p12 = pnand %p2101_p11, %p2097_p5 }
  0x74   : > { %2105 = shalt.err (!%p2102_p12)
}
  0x75   : > { %s2106_s11 = scalar_lea.vmem %s2419_s30, 2048  ;;  %s2202_s20 = smov [#allocation9]  }
  0x76   : > { %p2107_p13 = scmp.ne.s32.totalorder %s2419_s30, %s2106_s11  ;;  %s2111_s1 = sshll.u32 %s2202_s20, 4  ;;  %s2112_s1 = int_to_ptr.vmem [resolvable:$false] %s2111_s1 }
  0x77   : > { %s2113_s19 = scalar_lea.vmem %s2112_s1, 4096  ;;  %p2114_p7 = scmp.lt.s32.totalorder %s2419_s30, %s2112_s1 }
  0x78   : > { %p2109_p0 = pnand %p2107_p13, %p2312_p10  ;;  %p2115_p2 = scmp.lt.s32.totalorder %s2113_s19, %s2106_s11 }
  0x7a   : > { %p2110_p1 = pneg %p2109_p0  ;;  %p2116_p3 = por %p2115_p2, %p2114_p7 }
  0x7c   : > { %p2117_p4 = pnand %p2116_p3, %p2110_p1 }
  0x7e   : > { %2120 = shalt.err (!%p2117_p4)
}
  0x7f   : > { %s2685_s17 = smov 4   ;;  %s2686_s2 = smov 64  }
  0x80   : > { %1857 = dma.hbm_to_vmem [thread:$0]  (!%p2292_p8), %s2415_s18, 2048, %s2419_s30, %s310_s22, %s2686_s2, %s2686_s2, %s2685_s17  }
  0x81   : > { %p2687_p10 = scmp.ne.s32.totalorder %s2683_s8, 0 }
  0x82   : > { %s349_s23 = sand.u32 (!%p2687_p10), 1, %s2183_s25   ;;  %p2688_p5 = scmp.ne.s32.totalorder (!%p2687_p10), %s2679_s10, 0 }
  0x83   : > { %347 = sbr.rel (%p2687_p10) target bundleno = 2368 (0x940), region = 48  ;;  %s350_s16 = scalar_lea.sflag (!%p2687_p10), [#allocation4], %s349_s23 }
  0x84   : > { %s1832_s14 = smul.u32 (!%p2687_p10), 192, %s349_s23 }
  0x86   : > { %s2448_s27 = scalar_lea.vmem (!%p2687_p10), [#allocation3], %s1832_s14 }
  0x88   : > { %2162 = dma.done.wait (%p2688_p5), %s350_s16, 3072  }
  0x89   : > { %2164 = vsyncadd (%p2688_p5), %s350_s16, 4294964224  ;;  %s358_s12 = sand.u32 1, %s2268_s28   ;;  %s1635_s21 = sshll.u32 %s349_s23, 6 }
  0x8a   : > { %s359_s18 = scalar_lea.sflag [#allocation7], %s358_s12  ;;  %s2455_s30 = scalar_lea.vmem [#allocation6], %s1635_s21 }
  0x8b   : > { %2166 = dma.done.wait (%p2688_p5), %s359_s18, 3072  }
  0x8c   : > { %2168 = vsyncadd (%p2688_p5), %s359_s18, 4294964224  ;;  %s1636_s8 = sshll.u32 %s349_s23, 7  ;;  %s377_s13 = scalar_lea.sflag [#allocation10], %s349_s23 }
  0x8d   : > { %s2461_s22 = scalar_lea.vmem [#allocation8], %s1636_s8  ;;  %s2463_s15 = scalar_lea.vmem [#allocation9], %s1636_s8 }
  0x8e   : > { %2170 = dma.done.wait (%p2688_p5), %s377_s13, 2048  }
  0x8f   : > { %2172 = vsyncadd (%p2688_p5), %s377_s13, 4294965248  ;;  %p430_p8 = scmp.lt.s32.totalorder %s2268_s28, 1  ;;  %p1641_p6 = scmp.ne.s32.totalorder %s2268_s28, 0 }
  0x91   : > { %s431_s24 = scalar_select %p430_p8, %s2268_s28, 1 }
  0x92   : > { %443 = sbr.rel (%p1641_p6) target bundleno = 153 (0x99), region = 68 }
  0x93   : > { %s1717_s11 = sshll.u32 %s431_s24, 4  ;;  %s1640_s20 = sshll.u32 %s431_s24, 1 }
  0x94   : > { %s2474_s17 = scalar_lea.vmem %s2671_s5, %s1717_s11  ;;  %s2479_s14 = scalar_lea.vmem %s2672_s6, %s1640_s20 }
  0x97   : > { %v444_v0 = vld [vmem:[%s2666_s0] sm:$0xff]  ;;  %v445_v1 = vld [vmem:[%s2666_s0 + $0x8] sm:$0xff] }
  0x98   : > { %446 = vst [vmem:[#allocation2] sm:$0xff] %v444_v0  ;;  %447 = vst [vmem:[#allocation2 + $0x8] sm:$0xff] %v445_v1 }
  0x99 PF: > { %v1905_v2 = vld [vmem:[%s2448_s27 + $0xac] ss:$12 sps:$4 sm:$0xff]   ;;  %v1907_v3 = vld [vmem:[%s2448_s27 + $0xa8] ss:$12 sps:$4 sm:$0xff]   ;;  %v2203_v4 = vmov 0   ;;  %v2204_v5 = vmov 0.0   ;;  %v698_v31 = vlaneseq }
  0x9a   : > { %646 = vmatprep.mubr.bf16.mxu0 %v2203_v4  ;;  %1766 = vmatprep.subr.bf16.mxu1 %v2204_v5  ;;  %v1908_v6 = vld [vmem:[%s2448_s27 + $0x94] ss:$12 sps:$4 sm:$0xff]   ;;  %v1910_v7 = vld [vmem:[%s2448_s27 + $0x90] ss:$12 sps:$4 sm:$0xff]   ;;  %v1913_v9 = vld [vmem:[%s2448_s27 + $0x78] ss:$12 sps:$4 sm:$0xff]  }
  0x9b   : > { %614 = vmatprep.subr.bf16.mxu0 %v1905_v2  ;;  %v1911_v8 = vld [vmem:[%s2448_s27 + $0x7c] ss:$12 sps:$4 sm:$0xff]   ;;  %v1914_v10 = vld [vmem:[%s2448_s27 + $0x64] ss:$12 sps:$4 sm:$0xff]   ;;  %v1916_v11 = vld [vmem:[%s2448_s27 + $0x60] ss:$12 sps:$4 sm:$0xff]  }
  0x9c   : > { %615 = vmatpush1.bf16.msra.mxu0 %v1907_v3  ;;  %v1917_v12 = vld [vmem:[%s2448_s27 + $0x4c] ss:$12 sps:$4 sm:$0xff]   ;;  %v1929_v13 = vld [vmem:[%s2448_s27 + $0xb0] ss:$12 sps:$4 sm:$0xff]   ;;  %v1919_v15 = vld [vmem:[%s2448_s27 + $0x48] ss:$12 sps:$4 sm:$0xff]  }
  0x9d   : > { %616 = vmatprep.subr.bf16.mxu0 %v1908_v6  ;;  %1767 = vmatpush3.bf16.msra.mxu1 %v1929_v13  ;;  %v1930_v14 = vld [vmem:[%s2448_s27 + $0x98] ss:$12 sps:$4 sm:$0xff]   ;;  %v1920_v16 = vld [vmem:[%s2448_s27 + $0x34] ss:$12 sps:$4 sm:$0xff]   ;;  %v1922_v18 = vld [vmem:[%s2448_s27 + $0x30] ss:$12 sps:$4 sm:$0xff]  }
  0x9e   : > { %1768 = vmatprep.subr.bf16.mxu1 %v2204_v5  ;;  %v1931_v17 = vld [vmem:[%s2448_s27 + $0x80] ss:$12 sps:$4 sm:$0xff]   ;;  %v1923_v19 = vld [vmem:[%s2448_s27 + $0x1c] ss:$12 sps:$4 sm:$0xff]   ;;  %v1925_v21 = vld [vmem:[%s2448_s27 + $0x18] ss:$12 sps:$4 sm:$0xff]  }
  0x9f   : > { %v1932_v20 = vld [vmem:[%s2448_s27 + $0x68] ss:$12 sps:$4 sm:$0xff]   ;;  %v1926_v22 = vld [vmem:[%s2448_s27 + $0x4] ss:$12 sps:$4 sm:$0xff]   ;;  %v1928_v24 = vld [vmem:[%s2448_s27] ss:$12 sps:$4 sm:$0xff]  }
  0xa0   : > { %617 = vmatpush1.bf16.msra.mxu0 %v1910_v7  ;;  %v1933_v23 = vld [vmem:[%s2448_s27 + $0x50] ss:$12 sps:$4 sm:$0xff]   ;;  %v1934_v27 = vld [vmem:[%s2448_s27 + $0x38] ss:$12 sps:$4 sm:$0xff]   ;;  %v1935_v29 = vld [vmem:[%s2448_s27 + $0x20] ss:$12 sps:$4 sm:$0xff]  }
  0xa1   : > { %618 = vmatprep.subr.bf16.mxu0 %v1911_v8  ;;  %1769 = vmatpush3.bf16.msra.mxu1 %v1930_v14  ;;  %v2514_v25 = vld [vmem:[#allocation2] sm:$0xff]  ;;  %v2516_v26 = vld [vmem:[#allocation2 + $0x8] sm:$0xff]  ;;  %vm2205_vm0 = vmmov 0   ;;  %v2535_v32 = vshrl.u32 %v698_v31, 7  ;;  %vm841_vm1 = vcmask 1043456   ;;  %v805_v62 = vand.u32 127, %v698_v31 }
  0xa2   : > { %1770 = vmatprep.subr.bf16.mxu1 %v2204_v5  ;;  %v453_v28 = vpack.c.bf16 %v2516_v26, %v2514_v25  ;;  %v1936_v30 = vld [vmem:[%s2448_s27 + $0x8] ss:$12 sps:$4 sm:$0xff]   ;;  %1782 = vmatprep.mubr.msk.bf16.mxu1 %vm2205_vm0, %v2204_v5  ;;  %vm811_vm3 = vcmask 64512   ;;  %v1941_v31 = vld [vmem:[%s2455_s30 + $0x18] sm:$0xff]   ;;  %p1709_p9 = scmp.ne.s32.totalorder %s2268_s28, 1 }
  0xa3   : > { %v706_v33 = vsub.s32 1, %v2535_v32  ;;  %v2539_v34 = vld [vmem:[%s2474_s17] sm:$0xff]  ;;  %v700_v37 = vsub.s32 0, %v2535_v32  ;;  %v712_v50 = vsub.s32 2, %v2535_v32  ;;  %vm806_vm2 = vcmp.le.s32.totalorder %v805_v62, %v2535_v32 }
  0xa4   : > { %619 = vmatpush1.bf16.msra.mxu0 %v1913_v9 }
  0xa5   : > { %620 = vmatprep.subr.bf16.mxu0 %v1914_v10  ;;  %1771 = vmatpush3.bf16.msra.mxu1 %v1931_v17  ;;  %v707_v35 = vrot.slane %v2539_v34, %v706_v33  ;;  %v701_v40 = vrot.slane %v2539_v34, %v700_v37  ;;  %v713_v51 = vrot.slane %v2539_v34, %v712_v50 }
  0xa6   : > { %1772 = vmatprep.subr.bf16.mxu1 %v2204_v5 }
  0xa8   : > { %621 = vmatpush1.bf16.msra.mxu0 %v1916_v11 }
  0xa9   : > { %622 = vmatprep.subr.bf16.mxu0 %v1917_v12  ;;  %1773 = vmatpush3.bf16.msra.mxu1 %v1932_v20 }
  0xaa   : > { %1774 = vmatprep.subr.bf16.mxu1 %v2204_v5 }
  0xac   : > { %623 = vmatpush1.bf16.msra.mxu0 %v1919_v15 }
  0xad   : > { %624 = vmatprep.subr.bf16.mxu0 %v1920_v16  ;;  %1775 = vmatpush3.bf16.msra.mxu1 %v1933_v23 }
  0xae   : > { %1776 = vmatprep.subr.bf16.mxu1 %v2204_v5 }
  0xb0   : > { %625 = vmatpush1.bf16.msra.mxu0 %v1922_v18 }
  0xb1   : > { %626 = vmatprep.subr.bf16.mxu0 %v1923_v19  ;;  %1777 = vmatpush3.bf16.msra.mxu1 %v1934_v27  ;;  %v1937_v27 = vld [vmem:[%s2455_s30 + $0x38] sm:$0xff]  }
  0xb2   : > { %1778 = vmatprep.subr.bf16.mxu1 %v2204_v5 }
  0xb4   : > { %627 = vmatpush1.bf16.msra.mxu0 %v1925_v21 }
  0xb5   : > { %628 = vmatprep.subr.bf16.mxu0 %v1926_v22  ;;  %1779 = vmatpush3.bf16.msra.mxu1 %v1935_v29  ;;  %v1939_v29 = vld [vmem:[%s2455_s30 + $0x28] sm:$0xff]  }
  0xb6   : > { %1780 = vmatprep.subr.bf16.mxu1 %v2204_v5 }
  0xb8   : > { %629 = vmatpush1.bf16.msra.mxu0 %v1928_v24 }
  0xb9   : > { %1810 = vmatprep.subr.bf16.mxu0 %v2204_v5  ;;  %1781 = vmatpush3.bf16.msra.mxu1 %v1936_v30  ;;  %v1940_v30 = vld [vmem:[%s2455_s30 + $0x20] sm:$0xff]  }
  0xba   : > { %1786 = vmatprep.subr.bf16.mxu1 %v2204_v5 }
  0xbb   : > { %647 = vmatmul.mubr.bf16.vlgmr.msra.gmra.mxu0 %v453_v28 }
  0xbc   : > { %1826 = vmatprep.mubr.msk.bf16.mxu0 %vm2205_vm0, %v2204_v5  ;;  %1783 = vmatmul.mubr.bf16.vlgmr.msra.gmra.mxu1 %v453_v28  ;;  %v1938_v28 = vld [vmem:[%s2455_s30 + $0x30] sm:$0xff]  }
  0xbd   : > { %1788 = vmatprep.mubr.msk.bf16.mxu1 %vm2205_vm0, %v2204_v5  ;;  %1811 = vmatpush3.bf16.msra.mxu0 %v1937_v27 }
  0xbe   : > { %1812 = vmatprep.subr.bf16.mxu0 %v2204_v5 }
  0xc1   : > { %1813 = vmatpush3.bf16.msra.mxu0 %v1938_v28 }
  0xc2   : > { %1814 = vmatprep.subr.bf16.mxu0 %v2204_v5 }
  0xc5   : > { %1815 = vmatpush3.bf16.msra.mxu0 %v1939_v29 }
  0xc6   : > { %1816 = vmatprep.subr.bf16.mxu0 %v2204_v5 }
  0xc9   : > { %1817 = vmatpush3.bf16.msra.mxu0 %v1940_v30 }
  0xca   : > { %1818 = vmatprep.subr.bf16.mxu0 %v2204_v5 }
  0xcd   : > { %1819 = vmatpush3.bf16.msra.mxu0 %v1941_v31 }
  0xce   : > { %1820 = vmatprep.subr.bf16.mxu0 %v2204_v5 }
 0x17b   : > { %v648_v36 = vpop.f32.mrf.mxu0 }
 0x17c   : > { %v702_v44 = vadd.f32 %v701_v40, %v648_v36  ;;  %v691_v52 = vpop.f32.mrf.mxu1 }
 0x17d   : > { %v650_v38 = vpop.f32.mrf.mxu0  ;;  %v714_v53 = vadd.f32 %v713_v51, %v691_v52 }
 0x17e   : > { %v708_v39 = vadd.f32 %v707_v35, %v650_v38  ;;  %v716_v46 = vpack.c.bf16 %v702_v44, %v702_v44  ;;  %v1784_v54 = vpop.f32.mrf.mxu1  ;;  %v1942_v44 = vld [vmem:[%s2455_s30 + $0x10] sm:$0xff]  }
 0x17f   : > { %v652_v41 = vpop.f32.mrf.mxu0  ;;  %v836_v55 = vpack.c.bf16 %v714_v53, %v714_v53  ;;  %1821 = vmatpush3.bf16.msra.mxu0 %v1942_v44 }
 0x180   : > { %v718_v42 = vpack.c.bf16 %v708_v39, %v708_v39  ;;  %v703_v48 = vadd.f32 %v701_v40, %v652_v41  ;;  %v694_v56 = vpop.f32.mrf.mxu1  ;;  %1822 = vmatprep.subr.bf16.mxu0 %v2204_v5 }
 0x181   : > { %v654_v43 = vpop.f32.mrf.mxu0  ;;  %v843_v57 = vsel %vm841_vm1, %v836_v55, 0  ;;  %v715_v58 = vadd.f32 %v713_v51, %v694_v56  ;;  %v1039_v55 = vsub.s32 3, %v2535_v32 }
 0x182   : > { %1787 = vmatpush3.bf16.xpose.msra.mxu1 %v718_v42  ;;  %v709_v45 = vadd.f32 %v707_v35, %v654_v43  ;;  %v717_v49 = vpack.c.bf16 %v703_v48, %v703_v48  ;;  %v1785_v59 = vpop.f32.mrf.mxu1 }
 0x183   : > { %1792 = vmatprep.subr.bf16.mxu1 %v2204_v5  ;;  %v837_v60 = vpack.c.bf16 %v715_v58, %v715_v58  ;;  %v1040_v56 = vrot.slane %v2539_v34, %v1039_v55  ;;  %v1976_v55 = vld [vmem:[%s2463_s15 + $0x20] sm:$0xff]  }
 0x184   : > { %v719_v47 = vpack.c.bf16 %v709_v45, %v709_v45  ;;  %v1943_v45 = vld [vmem:[%s2455_s30 + $0x8] sm:$0xff]  }
 0x185   : > { %v889_v61 = vsel %vm841_vm1, %v837_v60, 0  ;;  %1823 = vmatpush3.bf16.msra.mxu0 %v1943_v45 }
 0x186   : > { %1824 = vmatprep.subr.bf16.mxu0 %v2204_v5 }
 0x189   : > { %1789 = vmatmul.mubr.bf16.vlgmr.msra.gmra.mxu1 %v716_v46  ;;  %v1944_v46 = vld [vmem:[%s2455_s30] sm:$0xff]  }
 0x18a   : > { %1793 = vmatpush3.bf16.xpose.msra.mxu1 %v719_v47  ;;  %1794 = vmatprep.mubr.msk.bf16.mxu1 %vm2205_vm0, %v2204_v5 }
 0x18b   : > { %1798 = vmatprep.subr.bf16.mxu1 %v2204_v5  ;;  %1825 = vmatpush3.bf16.msra.mxu0 %v1944_v46 }
 0x191   : > { %1795 = vmatmul.mubr.bf16.vlgmr.msra.gmra.mxu1 %v717_v49 }
 0x192   : > { %1800 = vmatprep.mubr.msk.bf16.mxu1 %vm2205_vm0, %v2204_v5  ;;  %1799 = vmatpush3.bf16.msra.mxu1 %v843_v57 }
 0x193   : > { %1804 = vmatprep.subr.bf16.mxu1 %v2204_v5 }
 0x249   : > { %v754_v63 = vpop.f32.mrf.mxu1 }
 0x24a   : > { %v800_v0 = vmul.f32 0.088388346, %v754_v63 }
 0x24b   : > { %v1790_v1 = vpop.f32.mrf.mxu1 }
 0x24c   : > { %v809_v2 = vsel %vm806_vm2, %v800_v0, -1e+30  ;;  %v1945_v0 = vld [vmem:[%s2461_s22 + $0x70] ss:$8 sps:$4 sm:$0xff]   ;;  %v1947_v1 = vld [vmem:[%s2461_s22 + $0x74] ss:$8 sps:$4 sm:$0xff]  }
 0x24d   : > { %v757_v3 = vpop.f32.mrf.mxu1  ;;  %v812_v6 = vsel %vm811_vm3, %v809_v2, -inf }
 0x24e   : > { %813 = vmax.xlane.f32.xlu0 %v812_v6 }
 0x24f   : > { %v1791_v7 = vpop.f32.mrf.mxu1 }
 0x251   : > { %v794_v8 = vpop.f32.mrf.mxu1 }
 0x252   : > { %v801_v9 = vmul.f32 0.088388346, %v794_v8 }
 0x253   : > { %v1796_v10 = vpop.f32.mrf.mxu1 }
 0x254   : > { %v810_v11 = vsel %vm806_vm2, %v801_v9, -1e+30  ;;  %v1950_v10 = vld [vmem:[%s2461_s22 + $0x64] ss:$8 sps:$4 sm:$0xff]  }
 0x255   : > { %v797_v12 = vpop.f32.mrf.mxu1  ;;  %v815_v13 = vsel %vm811_vm3, %v810_v11, -inf }
 0x256   : > { %816 = vmax.xlane.f32.xlu0 %v815_v13  ;;  %v1953_v12 = vld [vmem:[%s2461_s22 + $0x54] ss:$8 sps:$4 sm:$0xff]   ;;  %v1951_v13 = vld [vmem:[%s2461_s22 + $0x50] ss:$8 sps:$4 sm:$0xff]  }
 0x257   : > { %v1797_v14 = vpop.f32.mrf.mxu1 }
 0x258   : > { %v1954_v14 = vld [vmem:[%s2461_s22 + $0x40] ss:$8 sps:$4 sm:$0xff]  }
 0x2d7   : > { %v814_v15 = vpop.xlane.xlu0 %813 }
 0x2d8   : > { %v818_v16 = vsub.f32 %v809_v2, %v814_v15  ;;  %v1956_v15 = vld [vmem:[%s2461_s22 + $0x44] ss:$8 sps:$4 sm:$0xff]  }
 0x2da   : > { %v820_v17 = vmul.f32 1.442695, %v818_v16  ;;  %v1959_v16 = vld [vmem:[%s2461_s22 + $0x34] ss:$8 sps:$4 sm:$0xff]  }
 0x2dc   : > { %1985 = vpow2.f32 %v820_v17  ;;  %v1957_v17 = vld [vmem:[%s2461_s22 + $0x30] ss:$8 sps:$4 sm:$0xff]  }
 0x2df   : > { %v817_v18 = vpop.xlane.xlu0 %816 }
 0x2e0   : > { %v819_v19 = vsub.f32 %v810_v11, %v817_v18  ;;  %v1948_v11 = vld [vmem:[%s2461_s22 + $0x60] ss:$8 sps:$4 sm:$0xff]   ;;  %v1962_v18 = vld [vmem:[%s2461_s22 + $0x24] ss:$8 sps:$4 sm:$0xff]  }
 0x2e2   : > { %v822_v20 = vmul.f32 1.442695, %v819_v19  ;;  %v1960_v19 = vld [vmem:[%s2461_s22 + $0x20] ss:$8 sps:$4 sm:$0xff]  }
 0x2e4   : > { %1987 = vpow2.f32 %v822_v20  ;;  %v1965_v20 = vld [vmem:[%s2461_s22 + $0x14] ss:$8 sps:$4 sm:$0xff]  }
 0x2e9   : > { %v1986_v21 = vpop.eup %1985 }
 0x2ea   : > { %v824_v22 = vsel %vm811_vm3, %v1986_v21, 0.0 }
 0x2eb   : > { %825 = vadd.xlane.f32.xlu1 %v824_v22  ;;  %v1968_v22 = vld [vmem:[%s2461_s22 + $0x4] ss:$8 sps:$4 sm:$0xff]  }
 0x2f1   : > { %v1988_v23 = vpop.eup %1987 }
 0x2f2   : > { %v827_v24 = vsel %vm811_vm3, %v1988_v23, 0.0 }
 0x2f3   : > { %828 = vadd.xlane.f32.xlu1 %v827_v24 }
 0x374   : > { %v826_v35 = vpop.xlane.xlu1 %825 }
 0x375   : > { %1989 = vrcp.f32 %v826_v35  ;;  %v1070_v35 = vsub.s32 5, %v2535_v32 }
 0x37c   : > { %v829_v36 = vpop.xlane.xlu1 %828 }
 0x37d   : > { %1991 = vrcp.f32 %v829_v36 }
 0x382   : > { %v1990_v38 = vpop.eup %1989 }
 0x383   : > { %v832_v39 = vmul.f32 %v1990_v38, %v1986_v21  ;;  %v1963_v21 = vld [vmem:[%s2461_s22 + $0x10] ss:$8 sps:$4 sm:$0xff]  }
 0x385   : > { %v834_v40 = vpack.c.bf16 %v832_v39, %v832_v39  ;;  %v1071_v39 = vrot.slane %v2539_v34, %v1070_v35  ;;  %v1424_v35 = vsub.s32 4, %v2535_v32 }
 0x387   : > { %1801 = vmatmul.mubr.msk.bf16.vlgmr.msra.gmra.mxu1 %vm811_vm3, %v834_v40  ;;  %v1076_v40 = vsub.s32 6, %v2535_v32 }
 0x388   : > { %1805 = vmatpush3.bf16.msra.mxu1 %v889_v61  ;;  %1806 = vmatprep.mubr.msk.bf16.mxu1 %vm2205_vm0, %v2204_v5 }
 0x389   : > { %1188 = vmatprep.subr.bf16.mxu1 %v1947_v1  ;;  %v1077_v44 = vrot.slane %v2539_v34, %v1076_v40 }
 0x38a   : > { %v1992_v41 = vpop.eup %1991 }
 0x38b   : > { %v833_v42 = vmul.f32 %v1992_v41, %v1988_v23  ;;  %v1966_v23 = vld [vmem:[%s2461_s22] ss:$8 sps:$4 sm:$0xff]  }
 0x38d   : > { %v835_v43 = vpack.c.bf16 %v833_v42, %v833_v42 }
 0x38f   : > { %1807 = vmatmul.mubr.msk.bf16.vlgmr.msra.gmra.mxu1 %vm811_vm3, %v835_v43 }
 0x390   : > { %1220 = vmatprep.mubr.bf16.mxu1 %v2203_v4  ;;  %1189 = vmatpush1.bf16.msra.mxu1 %v1945_v0 }
 0x391   : > { %1190 = vmatprep.subr.bf16.mxu1 %v1950_v10 }
 0x394   : > { %1191 = vmatpush1.bf16.msra.mxu1 %v1948_v11 }
 0x395   : > { %1192 = vmatprep.subr.bf16.mxu1 %v1953_v12 }
 0x398   : > { %1193 = vmatpush1.bf16.msra.mxu1 %v1951_v13 }
 0x399   : > { %1194 = vmatprep.subr.bf16.mxu1 %v1956_v15 }
 0x39c   : > { %1195 = vmatpush1.bf16.msra.mxu1 %v1954_v14 }
 0x39d   : > { %1196 = vmatprep.subr.bf16.mxu1 %v1959_v16 }
 0x3a0   : > { %1197 = vmatpush1.bf16.msra.mxu1 %v1957_v17 }
 0x3a1   : > { %1198 = vmatprep.subr.bf16.mxu1 %v1962_v18 }
 0x3a4   : > { %1199 = vmatpush1.bf16.msra.mxu1 %v1960_v19 }
 0x3a5   : > { %1200 = vmatprep.subr.bf16.mxu1 %v1965_v20 }
 0x3a8   : > { %1201 = vmatpush1.bf16.msra.mxu1 %v1963_v21 }
 0x3a9   : > { %1202 = vmatprep.subr.bf16.mxu1 %v1968_v22 }
 0x3ac   : > { %1203 = vmatpush1.bf16.msra.mxu1 %v1966_v23 }
 0x447   : > { %v879_v47 = vpop.f32.mrf.mxu1 }
 0x449   : > { %v1802_v48 = vpop.f32.mrf.mxu1 }
 0x44b   : > { %v882_v49 = vpop.f32.mrf.mxu1 }
 0x44c   : > { %v1969_v49 = vld [vmem:[%s2463_s15 + $0x78] sm:$0xff]  }
 0x44d   : > { %v1803_v50 = vpop.f32.mrf.mxu1  ;;  %1744 = vmatprep.subr.bf16.mxu0 %v1969_v49 }
 0x44e   : > { %v1970_v50 = vld [vmem:[%s2463_s15 + $0x38] sm:$0xff]  }
 0x44f   : > { %v925_v51 = vpop.f32.mrf.mxu1 }
 0x450   : > { %v931_v52 = vpack.c.bf16 %v925_v51, %v879_v47  ;;  %v1971_v51 = vld [vmem:[%s2463_s15 + $0x70] sm:$0xff]  }
 0x451   : > { %v1808_v53 = vpop.f32.mrf.mxu1 }
 0x452   : > { %1827 = vmatmul.mubr.bf16.vlgmr.msra.gmra.mxu0 %v931_v52  ;;  %v1972_v52 = vld [vmem:[%s2463_s15 + $0x30] sm:$0xff]   ;;  %v1973_v53 = vld [vmem:[%s2463_s15 + $0x68] sm:$0xff]  }
 0x453   : > { %v928_v4 = vpop.f32.mrf.mxu1  ;;  %1745 = vmatpush3.bf16.msra.mxu0 %v1970_v50 }
 0x454   : > { %1746 = vmatprep.subr.bf16.mxu0 %v1971_v51  ;;  %v1974_v4 = vld [vmem:[%s2463_s15 + $0x28] sm:$0xff]  }
 0x455   : > { %v1809_v54 = vpop.f32.mrf.mxu1 }
 0x456   : > { %v1975_v54 = vld [vmem:[%s2463_s15 + $0x60] sm:$0xff]  }
 0x457   : > { %1747 = vmatpush3.bf16.msra.mxu0 %v1972_v52 }
 0x458   : > { %1748 = vmatprep.subr.bf16.mxu0 %v1973_v53 }
 0x45b   : > { %1749 = vmatpush3.bf16.msra.mxu0 %v1974_v4 }
 0x45c   : > { %1750 = vmatprep.subr.bf16.mxu0 %v1975_v54 }
 0x45f   : > { %1751 = vmatpush3.bf16.msra.mxu0 %v1976_v55 }
 0x512   : > { %v1030_v57 = vpop.f32.mrf.mxu0 }
 0x513   : > { %v1041_v5 = vadd.f32 %v1040_v56, %v1030_v57  ;;  %v1978_v57 = vld [vmem:[%s2463_s15 + $0x18] sm:$0xff]  }
 0x514   : > { %v1828_v58 = vpop.f32.mrf.mxu0 }
 0x515   : > { %v1043_v59 = vadd.f32 %v1041_v5, %v2514_v25  ;;  %v1979_v5 = vld [vmem:[%s2463_s15 + $0x50] sm:$0xff]  }
 0x516   : > { %v1033_v60 = vpop.f32.mrf.mxu0  ;;  %v1980_v58 = vld [vmem:[%s2463_s15 + $0x10] sm:$0xff]  }
 0x517   : > { %v1042_v61 = vadd.f32 %v1040_v56, %v1033_v60  ;;  %1045 = vadd.xlane.f32.xlu0 %v1043_v59  ;;  %v1977_v56 = vld [vmem:[%s2463_s15 + $0x58] sm:$0xff]   ;;  %v1982_v60 = vld [vmem:[%s2463_s15 + $0x8] sm:$0xff]  }
 0x518   : > { %v1829_v62 = vpop.f32.mrf.mxu0  ;;  %1752 = vmatprep.subr.bf16.mxu0 %v1977_v56 }
 0x519   : > { %v1044_v63 = vadd.f32 %v1042_v61, %v2516_v26  ;;  %1753 = vmatpush3.bf16.msra.mxu0 %v1978_v57  ;;  %v1983_v61 = vld [vmem:[%s2463_s15 + $0x40] sm:$0xff]  }
 0x51a   : > { %1754 = vmatprep.subr.bf16.mxu0 %v1979_v5  ;;  %v1984_v62 = vld [vmem:[%s2463_s15] sm:$0xff]  }
 0x51b   : > { %1047 = vadd.xlane.f32.xlu1 %v1044_v63 }
 0x51d   : > { %1755 = vmatpush3.bf16.msra.mxu0 %v1980_v58 }
 0x5a0   : > { %v1046_v2 = vpop.xlane.xlu0 %1045 }
 0x5a1   : > { %v1050_v3 = vmul.f32 0.0078125, %v1046_v2 }
 0x5a3   : > { %v1052_v6 = vsub.f32 %v1043_v59, %v1050_v3  ;;  %v1981_v59 = vld [vmem:[%s2463_s15 + $0x48] sm:$0xff]  }
 0x5a4   : > { %v1048_v25 = vpop.xlane.xlu1 %1047  ;;  %1756 = vmatprep.subr.bf16.mxu0 %v1981_v59 }
 0x5a5   : > { %v1051_v7 = vmul.f32 0.0078125, %v1048_v25  ;;  %v1054_v8 = vmul.f32 %v1052_v6, %v1052_v6  ;;  %1757 = vmatpush3.bf16.msra.mxu0 %v1982_v60 }
 0x5a6   : > { %1758 = vmatprep.subr.bf16.mxu0 %v1983_v61 }
 0x5a7   : > { %v1053_v9 = vsub.f32 %v1044_v63, %v1051_v7  ;;  %1056 = vadd.xlane.f32.xlu0 %v1054_v8  ;;  %v452_v63 = vld [vmem:[%s2479_s14] sm:$0x3] }
 0x5a8   : > { %v1101_v0 = vrot.slane %v452_v63, %v700_v37  ;;  %v1105_v1 = vrot.slane %v452_v63, %v706_v33 }
 0x5a9   : > { %v1055_v26 = vmul.f32 %v1053_v9, %v1053_v9  ;;  %1759 = vmatpush3.bf16.msra.mxu0 %v1984_v62 }
 0x5ab   : > { %1058 = vadd.xlane.f32.xlu1 %v1055_v26 }
 0x630   : > { %v1057_v24 = vpop.xlane.xlu0 %1056 }
 0x631   : > { %v1060_v27 = vmul.f32 0.0078125, %v1057_v24 }
 0x633   : > { %v1062_v28 = vadd.f32 1e-05, %v1060_v27 }
 0x634   : > { %v1059_v29 = vpop.xlane.xlu1 %1058 }
 0x635   : > { %1993 = vrsqrt.f32 %v1062_v28  ;;  %v1061_v30 = vmul.f32 0.0078125, %v1059_v29 }
 0x637   : > { %v1063_v31 = vadd.f32 1e-05, %v1061_v30 }
 0x639   : > { %1995 = vrsqrt.f32 %v1063_v31 }
 0x642   : > { %v1994_v36 = vpop.eup %1993 }
 0x643   : > { %v1066_v38 = vmul.f32 %v1994_v36, %v1052_v6 }
 0x645   : > { %v1072_v43 = vmul.f32 %v1071_v39, %v1066_v38  ;;  %v1425_v38 = vrot.slane %v2539_v34, %v1424_v35 }
 0x646   : > { %v1996_v41 = vpop.eup %1995 }
 0x647   : > { %v1067_v42 = vmul.f32 %v1996_v41, %v1053_v9  ;;  %v2606_v46 = vadd.f32 %v1077_v44, %v1072_v43 }
 0x649   : > { %v1073_v45 = vmul.f32 %v1071_v39, %v1067_v42 }
 0x64b   : > { %v2608_v47 = vadd.f32 %v1077_v44, %v1073_v45 }
 0x64d   : > { %v1080_v48 = vpack.c.bf16 %v2608_v47, %v2606_v46 }
 0x64f   : > { %1221 = vmatmul.mubr.bf16.vlgmr.msra.gmra.mxu1 %v1080_v48 }
 0x70f   : > { %v1222_v2 = vpop.f32.mrf.mxu1 }
 0x710   : > { %v1223_v3 = vadd.f32 %v1222_v2, %v1101_v0 }
 0x711   : > { %v1224_v6 = vpop.f32.mrf.mxu1 }
 0x712   : > { %v1225_v25 = vadd.f32 %v1224_v6, %v1105_v1  ;;  %v1235_v7 = vmul.f32 0.70710677, %v1223_v3  ;;  %v1231_v23 = vmul.f32 0.5, %v1223_v3 }
 0x713   : > { %v1226_v8 = vpop.f32.mrf.mxu1 }
 0x714   : > { %v1236_v9 = vmul.f32 0.70710677, %v1225_v25  ;;  %v1227_v26 = vadd.f32 %v1226_v8, %v1101_v0  ;;  %v1232_v20 = vmul.f32 0.5, %v1225_v25  ;;  %v1708_v0 = vld [vmem:[%s2474_s17 + $0x8] ss:$0 sm:$0xff] }
 0x715   : > { %v1228_v10 = vpop.f32.mrf.mxu1 }
 0x716   : > { %1997 = verf.f32 %v1236_v9  ;;  %v1237_v11 = vmul.f32 0.70710677, %v1227_v26  ;;  %v1229_v12 = vadd.f32 %v1228_v10, %v1105_v1  ;;  %v1233_v19 = vmul.f32 0.5, %v1227_v26 }
 0x717   : > { %1999 = verf.f32 %v1235_v7 }
 0x718   : > { %2001 = verf.f32 %v1237_v11  ;;  %v1238_v13 = vmul.f32 0.70710677, %v1229_v12  ;;  %v1234_v21 = vmul.f32 0.5, %v1229_v12 }
 0x71a   : > { %2003 = verf.f32 %v1238_v13 }
 0x723   : > { %v1998_v37 = vpop.eup %1997 }
 0x724   : > { %v2000_v14 = vpop.eup %1999  ;;  %v1244_v33 = vadd.f32 1.0, %v1998_v37 }
 0x725   : > { %v2002_v15 = vpop.eup %2001  ;;  %v1243_v18 = vadd.f32 1.0, %v2000_v14 }
 0x726   : > { %v1245_v16 = vadd.f32 1.0, %v2002_v15  ;;  %v1248_v27 = vmul.f32 %v1244_v33, %v1232_v20 }
 0x727   : > { %v2004_v17 = vpop.eup %2003  ;;  %v1247_v29 = vmul.f32 %v1243_v18, %v1231_v23 }
 0x728   : > { %v1246_v22 = vadd.f32 1.0, %v2004_v17  ;;  %v1249_v24 = vmul.f32 %v1245_v16, %v1233_v19 }
 0x72a   : > { %v1250_v28 = vmul.f32 %v1246_v22, %v1234_v21  ;;  %v1251_v31 = vpack.c.bf16 %v1249_v24, %v1247_v29 }
 0x72c   : > { %v1252_v30 = vpack.c.bf16 %v1250_v28, %v1248_v27 }
 0x72e   : > { %1413 = vmatprep.mubr.bf16.mxu0 %v1252_v30 }
 0x72f   : > { %1414 = vmatmul.mubr.bf16.vlgmr.msra.gmra.mxu0 %v1251_v31 }
 0x7ef   : > { %v1760_v36 = vpop.f32.mrf.mxu0 }
 0x7f1   : > { %v1761_v39 = vpop.f32.mrf.mxu0 }
 0x7f2   : > { %v1762_v40 = vadd.f32 %v1761_v39, %v1760_v36 }
 0x7f3   : > { %v1763_v41 = vpop.f32.mrf.mxu0 }
 0x7f4   : > { %v1426_v42 = vadd.f32 %v1762_v40, %v1425_v38 }
 0x7f5   : > { %v1764_v43 = vpop.f32.mrf.mxu0 }
 0x7f6   : > { %v1765_v44 = vadd.f32 %v1764_v43, %v1763_v41  ;;  %v1428_v45 = vadd.f32 %v1426_v42, %v2606_v46 }
 0x7f8   : > { %v1427_v48 = vadd.f32 %v1765_v44, %v1425_v38  ;;  %1430 = vadd.xlane.f32.xlu0 %v1428_v45 }
 0x7fa   : > { %v1429_v49 = vadd.f32 %v1427_v48, %v2608_v47  ;;  %v1454_v47 = vsub.s32 7, %v2535_v32 }
 0x7fc   : > { %1432 = vadd.xlane.f32.xlu1 %v1429_v49  ;;  %v1455_v61 = vrot.slane %v2539_v34, %v1454_v47 }
 0x881   : > { %v1431_v50 = vpop.xlane.xlu0 %1430 }
 0x882   : > { %v1434_v51 = vmul.f32 0.0078125, %v1431_v50 }
 0x884   : > { %v1436_v52 = vsub.f32 %v1428_v45, %v1434_v51 }
 0x885   : > { %v1433_v53 = vpop.xlane.xlu1 %1432 }
 0x886   : > { %v1435_v4 = vmul.f32 0.0078125, %v1433_v53  ;;  %v1438_v54 = vmul.f32 %v1436_v52, %v1436_v52 }
 0x888   : > { %v1437_v55 = vsub.f32 %v1429_v49, %v1435_v4  ;;  %1440 = vadd.xlane.f32.xlu0 %v1438_v54 }
 0x88a   : > { %v1439_v56 = vmul.f32 %v1437_v55, %v1437_v55 }
 0x88c   : > { %1442 = vadd.xlane.f32.xlu1 %v1439_v56 }
 0x911   : > { %v1441_v57 = vpop.xlane.xlu0 %1440 }
 0x912   : > { %v1444_v5 = vmul.f32 0.0078125, %v1441_v57 }
 0x914   : > { %v1446_v58 = vadd.f32 1e-05, %v1444_v5 }
 0x915   : > { %v1443_v46 = vpop.xlane.xlu1 %1442 }
 0x916   : > { %2005 = vrsqrt.f32 %v1446_v58  ;;  %v1445_v59 = vmul.f32 0.0078125, %v1443_v46 }
 0x918   : > { %v1447_v60 = vadd.f32 1e-05, %v1445_v59 }
 0x91a   : > { %2007 = vrsqrt.f32 %v1447_v60 }
 0x923   : > { %v2006_v62 = vpop.eup %2005 }
 0x924   : > { %v1450_v63 = vmul.f32 %v2006_v62, %v1436_v52 }
 0x926   : > { %v1456_v1 = vmul.f32 %v1455_v61, %v1450_v63 }
 0x927   : > { %v2008_v2 = vpop.eup %2007 }
 0x928   : > { %v1462_v3 = vadd.f32 %v1708_v0, %v1456_v1  ;;  %v1451_v6 = vmul.f32 %v2008_v2, %v1437_v55 }
 0x92a   : > { %1464 = vst [vmem:[#allocation2] sm:$0xff] %v1462_v3  ;;  %v1457_v25 = vmul.f32 %v1455_v61, %v1451_v6  ;;  %1469 = sbr.rel (%p1709_p9) target bundleno = 2352 (0x930), region = 72 }
 0x92c   : > { %v1463_v7 = vadd.f32 %v1708_v0, %v1457_v25 }
 0x92e   : > { %1465 = vst [vmem:[#allocation2 + $0x8] sm:$0xff] %v1463_v7 }
 0x92f   : > { %1470 = vst [vmem:[#allocation11] sm:$0xff] %v1462_v3  ;;  %1471 = vst [vmem:[#allocation11 + $0x8] sm:$0xff] %v1463_v7 }
 0x930 PF: > { %p1859_p11 = scmp.eq.s32.totalorder %s2268_s28, 1  ;;  %s2206_s27 = smov [#allocation11]  }
 0x931   : > { %s1478_s18 = sshll.u32 %s2206_s27, 4  ;;  %s1479_s18 = int_to_ptr.vmem [resolvable:$true] %s1478_s18 }
 0x932   : > { %s2121_s30 = scalar_lea.vmem %s1479_s18, 256  ;;  %p2128_p1 = scmp.lt.s32.totalorder %s1479_s18, %s1479_s18 }
 0x933   : > { %p2122_p12 = scmp.ne.s32.totalorder %s1479_s18, %s2121_s30  ;;  %p2129_p7 = scmp.lt.s32.totalorder %s2121_s30, %s2121_s30 }
 0x935   : > { %p2123_p13 = pnand %p2122_p12, %p1859_p11  ;;  %p2130_p2 = por %p2129_p7, %p2128_p1 }
 0x937   : > { %p2124_p0 = pneg %p2123_p13 }
 0x939   : > { %p2131_p3 = pnand %p2130_p2, %p2124_p0 }
 0x93b   : > { %2134 = shalt.err (!%p2131_p3)
}
 0x93c   : > { %s2207_s8 = smov 128   ;;  %s2208_s22 = smov 8  }
 0x93d   : > { %1842 = dma.vmem_to_hbm [thread:$0]  (%p1859_p11), %s1479_s18, 256, %s2673_s7, [#allocation5], %s2207_s8, %s2207_s8, %s2208_s22  }
 0x93e   : > { %2174 = dma.done.wait (%p1859_p11), [#allocation5], 256  }
 0x93f   : > { %2176 = vsyncadd (%p1859_p11), [#allocation5], 4294967040 }
 0x940 PF: > { %p24_p4 = scmp.ge.s32.totalorder %s2271_s29, 4   ;;  %s2689_s24 = smov %s2183_s25 }
 0x941   : > { %s2690_s25 = smov %s2187_s26  ;;  %s2691_s26 = smov %s2281_s9 }
 0x942   : > { %s2692_s27 = smov %s2271_s29  ;;  %26 = sbr.rel (!%p24_p4) target bundleno = 11 (0xb), region = 136 }
 0x947   :  { %1494 = vsyncpa [#allocation4], 1 }
 0x948   :  { %1496 = vsyncpa [#allocation4 + $0x1], 1 }
 0x949   :  { %1497 = vsyncpa [#allocation7], 1 }
 0x94a   :  { %1499 = vsyncpa [#allocation7 + $0x1], 1 }
 0x94b   :  { %1500 = vsyncpa [#allocation10], 1 }
 0x94c   :  { %1502 = vsyncpa [#allocation10 + $0x1], 1 }
 0x94d   :  { %1503 = vsyncpa [#allocation5], 1 }
 0x94e   :  { %1505 = vsyncpa [#allocation5 + $0x1], 1 }

</bundles_post_ra>
